<compile_context>
chip_gen: v6e
topology: v6e:2x2x1
jax: 0.10.0
libtpu: 0.0.40
codegen_flags: <defaults>
</compile_context>

<pallas_src>
import jax
import jax.numpy as jnp
from jax.experimental import pallas as pl
from jax.experimental.pallas import tpu as pltpu  # noqa: F401  (kept for TPU-specific tuning)

B = 2
H = W = 28
C_OUT = 16
POOL_H = POOL_W = 14
N_CELLS = POOL_H * POOL_W      # 196
CELL_PAD = 256                 # cells padded to a multiple of 128 for aligned lane slices
K_TAPS = 9                     # 3x3 taps (a 10th all-ones bias tap is appended)
FLAT = C_OUT * N_CELLS         # 3136
FLAT_PAD = C_OUT * CELL_PAD    # 4096
N_CLASSES = 10
N_PHASE = 4                    # 2x2 pool phases


def testnet_kernel(p_ref, wcb_ref, w2_ref, lb_ref, o_ref):
    # p_ref  : (10, 2048) bf16  im2col patches + all-ones bias-tap row,
    #                           lane = phase*512 + b*256 + cell (cells padded 196->256)
    # wcb_ref: (16, 10)   bf16  conv weight with the conv bias folded in as tap 9
    # w2_ref : (10, 4096) bf16  linear weight, col = c*256 + cell (zeros in cell-pad lanes)
    # lb_ref : (1, 10)    f32   linear bias
    # o_ref  : (B, 10)    f32   logits
    S = B * CELL_PAD                                        # 512 lanes per pool phase
    wcb = wcb_ref[...]

    # Conv(+bias) one pool-phase slab at a time; MaxPool2d(2,2) is a running max over
    # the 4 aligned phase slabs. Caps live f32 at (16, 512) instead of (16, 2048).
    pooled = jnp.dot(wcb, p_ref[:, 0:S], preferred_element_type=jnp.float32)
    for ph in range(1, N_PHASE):
        conv_ph = jnp.dot(wcb, p_ref[:, ph * S:(ph + 1) * S],
                          preferred_element_type=jnp.float32)
        pooled = jnp.maximum(pooled, conv_ph)               # (16, 512) f32

    # Re-pack (channel-on-sublane, batch*cell-on-lane) -> lane-dense (1, 16*256) rows
    # entirely in registers: 128-lane-aligned 256-wide slices + a lane-dim concat.
    # No VMEM scratch and no masked single-row stores (the old 32-store repack loop).
    # Garbage in the cell-pad lanes is finite (== conv bias) and hits zero weights.
    lb = lb_ref[...]
    for b in range(B):
        xrow = jnp.concatenate(
            [pooled[c:c + 1, b * CELL_PAD:(b + 1) * CELL_PAD] for c in range(C_OUT)],
            axis=1).astype(jnp.bfloat16)                    # (1, 4096) bf16, lane-dense
        logits = jax.lax.dot_general(
            xrow, w2_ref[...],
            dimension_numbers=(((1,), (1,)), ((), ())),     # contract the 4096 axis
            preferred_element_type=jnp.float32)             # (1, 10) f32
        o_ref[b:b + 1, :] = (logits + lb).astype(o_ref.dtype)


def pack_params(conv_w, conv_b, lin_w, lin_b):
    """One-time parameter packing (hoisted out of the per-call jitted forward)."""
    # Conv weight (16, 9) with the bias appended as a 10th column (bias tap).
    wcb = jnp.concatenate(
        [conv_w.reshape(C_OUT, K_TAPS), conv_b.reshape(C_OUT, 1)],
        axis=1).astype(jnp.bfloat16)                                     # (16, 10)
    # Linear weight: (10, 3136) -> (10, 16, 196) -> zero-pad cells -> (10, 4096), bf16.
    w2 = jnp.pad(lin_w.reshape(N_CLASSES, C_OUT, N_CELLS),
                 ((0, 0), (0, 0), (0, CELL_PAD - N_CELLS)))
    w2 = w2.reshape(N_CLASSES, FLAT_PAD).astype(jnp.bfloat16)            # (10, 4096)
    lb = lin_b.reshape(1, N_CLASSES).astype(jnp.float32)                 # (1, 10)
    return wcb, w2, lb


def testnet_forward(x, wcb, w2, lb):
    """x: (B, 1, 28, 28) NCHW f32; wcb/w2/lb pre-packed by pack_params. -> (B, 10) f32."""
    # --- glue: zero-pad and build im2col patches, taps on sublanes, lanes lane-dense ---
    xpad = jnp.pad(x[:, 0], ((0, 0), (1, 1), (1, 1)))                    # (B, 30, 30)
    pf = jnp.stack(
        [xpad[:, kh:kh + H, kw:kw + W] for kh in range(3) for kw in range(3)],
        axis=-1)                                                         # (B, 28, 28, 9)
    pf = pf.reshape(B, POOL_H, 2, POOL_W, 2, K_TAPS)                     # (b,py,dy,px,dx,t)
    pf = pf.transpose(2, 4, 0, 1, 3, 5).reshape(N_PHASE, B, N_CELLS, K_TAPS)
    pf = jnp.pad(pf, ((0, 0), (0, 0), (0, CELL_PAD - N_CELLS), (0, 0)))  # cells 196->256
    patches = pf.transpose(3, 0, 1, 2).reshape(K_TAPS, N_PHASE * B * CELL_PAD)  # (9, 2048)
    ones = jnp.ones((1, N_PHASE * B * CELL_PAD), patches.dtype)          # bias tap
    patches = jnp.concatenate([patches, ones], axis=0).astype(jnp.bfloat16)  # (10, 2048)

    return pl.pallas_call(
        testnet_kernel,
        out_shape=jax.ShapeDtypeStruct((B, N_CLASSES), jnp.float32),
    )(patches, wcb, w2, lb)


def ref_forward(x, conv_w, conv_b, lin_w, lin_b):
    # Pure-JAX reference of the (corrected) PyTorch module.
    conv = jax.lax.conv_general_dilated(
        x, conv_w, window_strides=(1, 1), padding=((1, 1), (1, 1)),
        dimension_numbers=("NCHW", "OIHW", "NCHW"))
    conv = conv + conv_b[None, :, None, None]
    pooled = jax.lax.reduce_window(conv, -jnp.inf, jax.lax.max,
                                   (1, 1, 2, 2), (1, 1, 2, 2), "VALID")
    flat = pooled.reshape(x.shape[0], -1)
    return flat @ lin_w.T + lin_b


if __name__ == "__main__":
    key = jax.random.PRNGKey(0)
    kx, kw1, kb1, kw2, kb2 = jax.random.split(key, 5)
    x = jax.random.normal(kx, (B, 1, H, W), jnp.float32)
    conv_w = jax.random.normal(kw1, (C_OUT, 1, 3, 3), jnp.float32) * 0.3
    conv_b = jax.random.normal(kb1, (C_OUT,), jnp.float32) * 0.1
    lin_w = jax.random.normal(kw2, (N_CLASSES, FLAT), jnp.float32) * 0.02
    lin_b = jax.random.normal(kb2, (N_CLASSES,), jnp.float32) * 0.1

    # One-time weight packing, outside the per-call jitted forward.
    wcb, w2, lb = pack_params(conv_w, conv_b, lin_w, lin_b)
    wcb, w2, lb = jax.device_put(wcb), jax.device_put(w2), jax.device_put(lb)

    fwd = jax.jit(testnet_forward)
    out = jax.block_until_ready(fwd(x, wcb, w2, lb))

    ref = ref_forward(x, conv_w, conv_b, lin_w, lin_b)
    assert out.shape == (B, N_CLASSES)
    assert jnp.allclose(out, ref, rtol=5e-2, atol=5e-2), (out, ref)
    print("KERNEL_OK")
</pallas_src>

<mosaic_0001>
module attributes {stable_mosaic.version = 11 : i64} {
  func.func @testnet_kernel(%arg0: memref<10x2048xbf16, #tpu.memory_space<vmem>>, %arg1: memref<16x10xbf16, #tpu.memory_space<vmem>>, %arg2: memref<10x4096xbf16, #tpu.memory_space<vmem>>, %arg3: memref<1x10xf32, #tpu.memory_space<vmem>>, %arg4: memref<2x10xf32, #tpu.memory_space<vmem>>) attributes {dimension_semantics = [], scalar_prefetch = 0 : i64, scratch_operands = 0 : i64, tpu.core_type = #tpu.core_type<tc>} {
    %c0 = arith.constant 0 : index
    %c0_0 = arith.constant 0 : index
    %0 = vector.load %arg1[%c0, %c0_0] : memref<16x10xbf16, #tpu.memory_space<vmem>>, vector<16x10xbf16>
    %c0_1 = arith.constant 0 : index
    %c0_2 = arith.constant 0 : index
    %1 = vector.load %arg0[%c0_1, %c0_2] : memref<10x2048xbf16, #tpu.memory_space<vmem>>, vector<10x512xbf16>
    %cst = arith.constant dense<0.000000e+00> : vector<16x512xf32>
    %2 = tpu.matmul %0, %1, %cst {dimension_numbers = #tpu.dot_dimension_numbers<[1], [0], [0], [1], [0, 0, 1, 1], [], []>} : vector<16x10xbf16>, vector<10x512xbf16>, vector<16x512xf32> -> vector<16x512xf32>
    %c0_3 = arith.constant 0 : index
    %c512 = arith.constant 512 : index
    %3 = vector.load %arg0[%c0_3, %c512] : memref<10x2048xbf16, #tpu.memory_space<vmem>>, vector<10x512xbf16>
    %cst_4 = arith.constant dense<0.000000e+00> : vector<16x512xf32>
    %4 = tpu.matmul %0, %3, %cst_4 {dimension_numbers = #tpu.dot_dimension_numbers<[1], [0], [0], [1], [0, 0, 1, 1], [], []>} : vector<16x10xbf16>, vector<10x512xbf16>, vector<16x512xf32> -> vector<16x512xf32>
    %5 = arith.maximumf %2, %4 : vector<16x512xf32>
    %c0_5 = arith.constant 0 : index
    %c1024 = arith.constant 1024 : index
    %6 = vector.load %arg0[%c0_5, %c1024] : memref<10x2048xbf16, #tpu.memory_space<vmem>>, vector<10x512xbf16>
    %cst_6 = arith.constant dense<0.000000e+00> : vector<16x512xf32>
    %7 = tpu.matmul %0, %6, %cst_6 {dimension_numbers = #tpu.dot_dimension_numbers<[1], [0], [0], [1], [0, 0, 1, 1], [], []>} : vector<16x10xbf16>, vector<10x512xbf16>, vector<16x512xf32> -> vector<16x512xf32>
    %8 = arith.maximumf %5, %7 : vector<16x512xf32>
    %c0_7 = arith.constant 0 : index
    %c1536 = arith.constant 1536 : index
    %9 = vector.load %arg0[%c0_7, %c1536] : memref<10x2048xbf16, #tpu.memory_space<vmem>>, vector<10x512xbf16>
    %cst_8 = arith.constant dense<0.000000e+00> : vector<16x512xf32>
    %10 = tpu.matmul %0, %9, %cst_8 {dimension_numbers = #tpu.dot_dimension_numbers<[1], [0], [0], [1], [0, 0, 1, 1], [], []>} : vector<16x10xbf16>, vector<10x512xbf16>, vector<16x512xf32> -> vector<16x512xf32>
    %11 = arith.maximumf %8, %10 : vector<16x512xf32>
    %c0_9 = arith.constant 0 : index
    %c0_10 = arith.constant 0 : index
    %12 = vector.load %arg3[%c0_9, %c0_10] : memref<1x10xf32, #tpu.memory_space<vmem>>, vector<1x10xf32>
    %13 = vector.extract_strided_slice %11 {offsets = [0, 0], sizes = [1, 256], strides = [1, 1]} : vector<16x512xf32> to vector<1x256xf32>
    %14 = vector.extract_strided_slice %11 {offsets = [1, 0], sizes = [1, 256], strides = [1, 1]} : vector<16x512xf32> to vector<1x256xf32>
    %15 = vector.extract_strided_slice %11 {offsets = [2, 0], sizes = [1, 256], strides = [1, 1]} : vector<16x512xf32> to vector<1x256xf32>
    %16 = vector.extract_strided_slice %11 {offsets = [3, 0], sizes = [1, 256], strides = [1, 1]} : vector<16x512xf32> to vector<1x256xf32>
    %17 = vector.extract_strided_slice %11 {offsets = [4, 0], sizes = [1, 256], strides = [1, 1]} : vector<16x512xf32> to vector<1x256xf32>
    %18 = vector.extract_strided_slice %11 {offsets = [5, 0], sizes = [1, 256], strides = [1, 1]} : vector<16x512xf32> to vector<1x256xf32>
    %19 = vector.extract_strided_slice %11 {offsets = [6, 0], sizes = [1, 256], strides = [1, 1]} : vector<16x512xf32> to vector<1x256xf32>
    %20 = vector.extract_strided_slice %11 {offsets = [7, 0], sizes = [1, 256], strides = [1, 1]} : vector<16x512xf32> to vector<1x256xf32>
    %21 = vector.extract_strided_slice %11 {offsets = [8, 0], sizes = [1, 256], strides = [1, 1]} : vector<16x512xf32> to vector<1x256xf32>
    %22 = vector.extract_strided_slice %11 {offsets = [9, 0], sizes = [1, 256], strides = [1, 1]} : vector<16x512xf32> to vector<1x256xf32>
    %23 = vector.extract_strided_slice %11 {offsets = [10, 0], sizes = [1, 256], strides = [1, 1]} : vector<16x512xf32> to vector<1x256xf32>
    %24 = vector.extract_strided_slice %11 {offsets = [11, 0], sizes = [1, 256], strides = [1, 1]} : vector<16x512xf32> to vector<1x256xf32>
    %25 = vector.extract_strided_slice %11 {offsets = [12, 0], sizes = [1, 256], strides = [1, 1]} : vector<16x512xf32> to vector<1x256xf32>
    %26 = vector.extract_strided_slice %11 {offsets = [13, 0], sizes = [1, 256], strides = [1, 1]} : vector<16x512xf32> to vector<1x256xf32>
    %27 = vector.extract_strided_slice %11 {offsets = [14, 0], sizes = [1, 256], strides = [1, 1]} : vector<16x512xf32> to vector<1x256xf32>
    %28 = vector.extract_strided_slice %11 {offsets = [15, 0], sizes = [1, 256], strides = [1, 1]} : vector<16x512xf32> to vector<1x256xf32>
    %29 = tpu.concatenate %13, %14, %15, %16, %17, %18, %19, %20, %21, %22, %23, %24, %25, %26, %27, %28 in 1 : vector<1x256xf32>, vector<1x256xf32>, vector<1x256xf32>, vector<1x256xf32>, vector<1x256xf32>, vector<1x256xf32>, vector<1x256xf32>, vector<1x256xf32>, vector<1x256xf32>, vector<1x256xf32>, vector<1x256xf32>, vector<1x256xf32>, vector<1x256xf32>, vector<1x256xf32>, vector<1x256xf32>, vector<1x256xf32> -> vector<1x4096xf32>
    %30 = arith.truncf %29 : vector<1x4096xf32> to vector<1x4096xbf16>
    %c0_11 = arith.constant 0 : index
    %c0_12 = arith.constant 0 : index
    %31 = vector.load %arg2[%c0_11, %c0_12] : memref<10x4096xbf16, #tpu.memory_space<vmem>>, vector<10x4096xbf16>
    %cst_13 = arith.constant dense<0.000000e+00> : vector<1x10xf32>
    %32 = tpu.matmul %30, %31, %cst_13 {dimension_numbers = #tpu.dot_dimension_numbers<[1], [1], [0], [0], [0, 0, 1, 0], [], []>} : vector<1x4096xbf16>, vector<10x4096xbf16>, vector<1x10xf32> -> vector<1x10xf32>
    %33 = arith.addf %32, %12 : vector<1x10xf32>
    %c0_14 = arith.constant 0 : index
    %c0_15 = arith.constant 0 : index
    %34 = vector.load %arg4[%c0_14, %c0_15] : memref<2x10xf32, #tpu.memory_space<vmem>>, vector<1x10xf32>
    tpu.vector_store %arg4[%c0_14, %c0_15], %33 {strides = array<i32>} : memref<2x10xf32, #tpu.memory_space<vmem>>, vector<1x10xf32>,
    %35 = vector.extract_strided_slice %11 {offsets = [0, 256], sizes = [1, 256], strides = [1, 1]} : vector<16x512xf32> to vector<1x256xf32>
    %36 = vector.extract_strided_slice %11 {offsets = [1, 256], sizes = [1, 256], strides = [1, 1]} : vector<16x512xf32> to vector<1x256xf32>
    %37 = vector.extract_strided_slice %11 {offsets = [2, 256], sizes = [1, 256], strides = [1, 1]} : vector<16x512xf32> to vector<1x256xf32>
    %38 = vector.extract_strided_slice %11 {offsets = [3, 256], sizes = [1, 256], strides = [1, 1]} : vector<16x512xf32> to vector<1x256xf32>
    %39 = vector.extract_strided_slice %11 {offsets = [4, 256], sizes = [1, 256], strides = [1, 1]} : vector<16x512xf32> to vector<1x256xf32>
    %40 = vector.extract_strided_slice %11 {offsets = [5, 256], sizes = [1, 256], strides = [1, 1]} : vector<16x512xf32> to vector<1x256xf32>
    %41 = vector.extract_strided_slice %11 {offsets = [6, 256], sizes = [1, 256], strides = [1, 1]} : vector<16x512xf32> to vector<1x256xf32>
    %42 = vector.extract_strided_slice %11 {offsets = [7, 256], sizes = [1, 256], strides = [1, 1]} : vector<16x512xf32> to vector<1x256xf32>
    %43 = vector.extract_strided_slice %11 {offsets = [8, 256], sizes = [1, 256], strides = [1, 1]} : vector<16x512xf32> to vector<1x256xf32>
    %44 = vector.extract_strided_slice %11 {offsets = [9, 256], sizes = [1, 256], strides = [1, 1]} : vector<16x512xf32> to vector<1x256xf32>
    %45 = vector.extract_strided_slice %11 {offsets = [10, 256], sizes = [1, 256], strides = [1, 1]} : vector<16x512xf32> to vector<1x256xf32>
    %46 = vector.extract_strided_slice %11 {offsets = [11, 256], sizes = [1, 256], strides = [1, 1]} : vector<16x512xf32> to vector<1x256xf32>
    %47 = vector.extract_strided_slice %11 {offsets = [12, 256], sizes = [1, 256], strides = [1, 1]} : vector<16x512xf32> to vector<1x256xf32>
    %48 = vector.extract_strided_slice %11 {offsets = [13, 256], sizes = [1, 256], strides = [1, 1]} : vector<16x512xf32> to vector<1x256xf32>
    %49 = vector.extract_strided_slice %11 {offsets = [14, 256], sizes = [1, 256], strides = [1, 1]} : vector<16x512xf32> to vector<1x256xf32>
    %50 = vector.extract_strided_slice %11 {offsets = [15, 256], sizes = [1, 256], strides = [1, 1]} : vector<16x512xf32> to vector<1x256xf32>
    %51 = tpu.concatenate %35, %36, %37, %38, %39, %40, %41, %42, %43, %44, %45, %46, %47, %48, %49, %50 in 1 : vector<1x256xf32>, vector<1x256xf32>, vector<1x256xf32>, vector<1x256xf32>, vector<1x256xf32>, vector<1x256xf32>, vector<1x256xf32>, vector<1x256xf32>, vector<1x256xf32>, vector<1x256xf32>, vector<1x256xf32>, vector<1x256xf32>, vector<1x256xf32>, vector<1x256xf32>, vector<1x256xf32>, vector<1x256xf32> -> vector<1x4096xf32>
    %52 = arith.truncf %51 : vector<1x4096xf32> to vector<1x4096xbf16>
    %c0_16 = arith.constant 0 : index
    %c0_17 = arith.constant 0 : index
    %53 = vector.load %arg2[%c0_16, %c0_17] : memref<10x4096xbf16, #tpu.memory_space<vmem>>, vector<10x4096xbf16>
    %cst_18 = arith.constant dense<0.000000e+00> : vector<1x10xf32>
    %54 = tpu.matmul %52, %53, %cst_18 {dimension_numbers = #tpu.dot_dimension_numbers<[1], [1], [0], [0], [0, 0, 1, 0], [], []>} : vector<1x4096xbf16>, vector<10x4096xbf16>, vector<1x10xf32> -> vector<1x10xf32>
    %55 = arith.addf %54, %12 : vector<1x10xf32>
    %c1 = arith.constant 1 : index
    %c0_19 = arith.constant 0 : index
    %56 = vector.load %arg4[%c1, %c0_19] : memref<2x10xf32, #tpu.memory_space<vmem>>, vector<1x10xf32>
    tpu.vector_store %arg4[%c1, %c0_19], %55 {strides = array<i32>} : memref<2x10xf32, #tpu.memory_space<vmem>>, vector<1x10xf32>,
    return
  }
}

</mosaic_0001>

<bundles_post_ra>
// kernel: testnet_forward.1
= control target key start
LH: loop header
LB: loop body
LE: loop exit
PB: predicated region body
PF: predicated region fallthrough
CT: control target
= control target key end

     0   :  { %vm50_vm0 = vcmask 1044480   ;;  %v2515_v4 = vmov 0   ;;  %vm46_vm1 = vcmask 80896   ;;  %s3016_s0 = inlined_call_operand.vmem [shape: bf16[10,2048], index: 0, kind: input, shape index: {}]   ;;  %s3017_s1 = inlined_call_operand.vmem [shape: bf16[16,10], index: 1, kind: input, shape index: {}]   ;;  %s3018_s2 = inlined_call_operand.vmem [shape: bf16[10,4096], index: 2, kind: input, shape index: {}]   ;;  %s3019_s3 = inlined_call_operand.vmem [shape: f32[1,10], index: 3, kind: input, shape index: {}]   ;;  %s3020_s4 = inlined_call_operand.hbm [shape: f32[2,10], index: 4, kind: output, shape index: {}]  }
   0x1   :  { %v21_v0 = vld [vmem:[%s3016_s0] sm:$0xff]  ;;  %95 = vmatprep.mubr.bf16.mxu0 %v2515_v4  ;;  %v149_v5 = vld [vmem:[%s3016_s0 + $0x10] sm:$0xff]  ;;  %138 = vmatprep.mubr.bf16.mxu1 %v2515_v4  ;;  %v22_v13 = vld [vmem:[%s3016_s0 + $0x8] sm:$0xff] }
   0x2   :  { %v23_v1 = vld [vmem:[%s3016_s0 + $0x40] sm:$0x11]  ;;  %v151_v6 = vld [vmem:[%s3016_s0 + $0x50] sm:$0x11]  ;;  %v24_v14 = vld [vmem:[%s3016_s0 + $0x48] sm:$0x11] }
   0x3   :  { %v2395_v2 = vcombine.high %v21_v0, %v23_v1  ;;  %v2394_v3 = vcombine.low %v21_v0, %v23_v1  ;;  %v275_v7 = vld [vmem:[%s3016_s0 + $0x20] sm:$0xff]  ;;  %v2403_v11 = vcombine.high %v149_v5, %v151_v6  ;;  %v2402_v12 = vcombine.low %v149_v5, %v151_v6  ;;  %v150_v15 = vld [vmem:[%s3016_s0 + $0x18] sm:$0xff] }
   0x4   :  { %v277_v8 = vld [vmem:[%s3016_s0 + $0x60] sm:$0x11]  ;;  %v152_v16 = vld [vmem:[%s3016_s0 + $0x58] sm:$0x11]  ;;  %v2397_v19 = vcombine.high %v22_v13, %v24_v14  ;;  %v2396_v20 = vcombine.low %v22_v13, %v24_v14 }
   0x5   :  { %2398 = vmatprep.subr.msk.bf16.mxu0 %vm50_vm0, %v2395_v2  ;;  %v52_v9 = vsel %vm50_vm0, %v2394_v3, 0  ;;  %v2492_v10 = vld [vmem:[%s3017_s1] sm:$0xff]   ;;  %v170_v17 = vsel %vm50_vm0, %v2402_v12, 0  ;;  %v2411_v18 = vcombine.high %v275_v7, %v277_v8  ;;  %v2405_v21 = vcombine.high %v150_v15, %v152_v16 }
   0x6   :  { %78 = vmatpush1.bf16.msra.mxu0 %v52_v9  ;;  %v2404_v22 = vcombine.low %v150_v15, %v152_v16 }
   0x7   :  { %2406 = vmatprep.subr.msk.bf16.mxu0 %vm50_vm0, %v2403_v11 }
   0x8   :  { %9 = vsyncpa [#allocation3], 0  ;;  %2400 = vmatprep.subr.msk.bf16.mxu1 %vm50_vm0, %v2397_v19  ;;  %v58_v23 = vsel %vm50_vm0, %v2396_v20, 0  ;;  %v276_v24 = vld [vmem:[%s3016_s0 + $0x28] sm:$0xff]  ;;  %v2410_v26 = vcombine.low %v275_v7, %v277_v8  ;;  %v401_v27 = vld [vmem:[%s3016_s0 + $0x30] sm:$0xff]  ;;  %v176_v29 = vsel %vm50_vm0, %v2404_v22, 0 }
   0x9   :  { %2399 = vmatmul.mubr.msk.bf16.vlgmr.msra.gmra.mxu0 %vm46_vm1, %v2492_v10  ;;  %v278_v25 = vld [vmem:[%s3016_s0 + $0x68] sm:$0x11]  ;;  %121 = vmatpush1.bf16.msra.mxu1 %v58_v23  ;;  %v403_v28 = vld [vmem:[%s3016_s0 + $0x70] sm:$0x11]  ;;  %v402_v34 = vld [vmem:[%s3016_s0 + $0x38] sm:$0xff]  ;;  %vm1452_vm2 = vcmask 73728  }
   0xa   :  { %196 = vmatpush1.bf16.msra.mxu0 %v170_v17  ;;  %213 = vmatprep.mubr.bf16.mxu0 %v2515_v4  ;;  %v2413_v30 = vcombine.high %v276_v24, %v278_v25  ;;  %v296_v31 = vsel %vm50_vm0, %v2410_v26, 0  ;;  %v2419_v32 = vcombine.high %v401_v27, %v403_v28  ;;  %v2412_v33 = vcombine.low %v276_v24, %v278_v25  ;;  %v404_v35 = vld [vmem:[%s3016_s0 + $0x78] sm:$0x11]  ;;  %v2628_v42 = vld [vmem:[%s3018_s2] sm:$0xff]  ;;  %v2638_v46 = vld [vmem:[%s3018_s2 + $0x8] sm:$0xff] }
   0xb   :  { %2414 = vmatprep.subr.msk.bf16.mxu0 %vm50_vm0, %v2411_v18  ;;  %2408 = vmatprep.subr.msk.bf16.mxu1 %vm50_vm0, %v2405_v21  ;;  %v2418_v36 = vcombine.low %v401_v27, %v403_v28  ;;  %v2421_v38 = vcombine.high %v402_v34, %v404_v35  ;;  %v2420_v40 = vcombine.low %v402_v34, %v404_v35  ;;  %v636_v43 = vld [vmem:[%s3018_s2 + $0x80] sm:$0x11]  ;;  %v637_v47 = vld [vmem:[%s3018_s2 + $0x88] sm:$0x11]  ;;  %v2648_v50 = vld [vmem:[%s3018_s2 + $0x10] sm:$0xff] }
   0xc   :  { %2401 = vmatmul.mubr.msk.bf16.vlgmr.msra.gmra.mxu1 %vm46_vm1, %v2492_v10  ;;  %v302_v37 = vsel %vm50_vm0, %v2412_v33, 0  ;;  %v2427_v44 = vcombine.high %v2628_v42, %v636_v43  ;;  %v2426_v45 = vcombine.low %v2628_v42, %v636_v43  ;;  %v2429_v48 = vcombine.high %v2638_v46, %v637_v47  ;;  %v638_v51 = vld [vmem:[%s3018_s2 + $0x90] sm:$0x11]  ;;  %v2657_v53 = vld [vmem:[%s3018_s2 + $0x18] sm:$0xff]  ;;  %v640_v14 = vld [vmem:[%s3018_s2 + $0xa0] sm:$0x11] }
   0xd   :  { %239 = vmatpush1.bf16.msra.mxu1 %v176_v29  ;;  %256 = vmatprep.mubr.bf16.mxu1 %v2515_v4  ;;  %v422_v39 = vsel %vm50_vm0, %v2418_v36, 0  ;;  %v428_v41 = vsel %vm50_vm0, %v2420_v40, 0  ;;  %v2428_v49 = vcombine.low %v2638_v46, %v637_v47  ;;  %v2431_v52 = vcombine.high %v2648_v50, %v638_v51  ;;  %v639_v54 = vld [vmem:[%s3018_s2 + $0x98] sm:$0x11]  ;;  %v2693_v19 = vld [vmem:[%s3018_s2 + $0x20] sm:$0xff]  ;;  %v2698_v20 = vld [vmem:[%s3018_s2 + $0x28] sm:$0xff] }
   0xe   :  { %2416 = vmatprep.subr.msk.bf16.mxu1 %vm50_vm0, %v2413_v30  ;;  %v2433_v55 = vcombine.high %v2657_v53, %v639_v54  ;;  %v2430_v16 = vcombine.low %v2648_v50, %v638_v51  ;;  %v641_v21 = vld [vmem:[%s3018_s2 + $0xa8] sm:$0x11]  ;;  %v2432_v26 = vcombine.low %v2657_v53, %v639_v54  ;;  %v2435_v28 = vcombine.high %v2693_v19, %v640_v14  ;;  %v2716_v34 = vld [vmem:[%s3018_s2 + $0x30] sm:$0xff]  ;;  %v2729_v40 = vld [vmem:[%s3018_s2 + $0x38] sm:$0xff] }
   0xf   :  { %v2437_v30 = vcombine.high %v2698_v20, %v641_v21  ;;  %v642_v35 = vld [vmem:[%s3018_s2 + $0xb0] sm:$0x11]  ;;  %v2436_v47 = vcombine.low %v2698_v20, %v641_v21 }
  0x11   :  { %2407 = vmatmul.mubr.msk.bf16.vlgmr.msra.gmra.mxu0 %vm46_vm1, %v2492_v10 }
  0x12   :  { %322 = vmatpush1.bf16.msra.mxu0 %v296_v31  ;;  %339 = vmatprep.mubr.bf16.mxu0 %v2515_v4 }
  0x13   :  { %2422 = vmatprep.subr.msk.bf16.mxu0 %vm50_vm0, %v2419_v32 }
  0x14   :  { %2409 = vmatmul.mubr.msk.bf16.vlgmr.msra.gmra.mxu1 %vm46_vm1, %v2492_v10 }
  0x15   :  { %365 = vmatpush1.bf16.msra.mxu1 %v302_v37  ;;  %382 = vmatprep.mubr.bf16.mxu1 %v2515_v4 }
  0x16   :  { %2424 = vmatprep.subr.msk.bf16.mxu1 %vm50_vm0, %v2421_v38  ;;  %v2434_v38 = vcombine.low %v2693_v19, %v640_v14 }
  0x19   :  { %2415 = vmatmul.mubr.msk.bf16.vlgmr.msra.gmra.mxu0 %vm46_vm1, %v2492_v10 }
  0x1a   :  { %448 = vmatpush1.bf16.msra.mxu0 %v422_v39  ;;  %465 = vmatprep.mubr.bf16.mxu0 %v2515_v4 }
  0x1b   :  { %826 = vmatprep.subr.bf16.mxu0 %v2427_v44  ;;  %v2439_v44 = vcombine.high %v2716_v34, %v642_v35 }
  0x1c   :  { %2417 = vmatmul.mubr.msk.bf16.vlgmr.msra.gmra.mxu1 %vm46_vm1, %v2492_v10 }
  0x1d   :  { %491 = vmatpush1.bf16.msra.mxu1 %v428_v41  ;;  %508 = vmatprep.mubr.bf16.mxu1 %v2515_v4  ;;  %v643_v41 = vld [vmem:[%s3018_s2 + $0xb8] sm:$0x11] }
  0x1e   :  { %866 = vmatprep.subr.bf16.mxu1 %v2429_v48  ;;  %v2441_v51 = vcombine.high %v2729_v40, %v643_v41 }
  0x21   :  { %2423 = vmatmul.mubr.msk.bf16.vlgmr.msra.gmra.mxu0 %vm46_vm1, %v2492_v10 }
  0x22   :  { %827 = vmatpush1.bf16.xpose.msra.mxu0 %v2426_v45 }
  0x23   :  { %906 = vmatprep.subr.bf16.mxu0 %v2431_v52 }
  0x24   :  { %2425 = vmatmul.mubr.msk.bf16.vlgmr.msra.gmra.mxu1 %vm46_vm1, %v2492_v10 }
  0x25   :  { %867 = vmatpush1.bf16.xpose.msra.mxu1 %v2428_v49 }
  0x26   :  { %946 = vmatprep.subr.bf16.mxu1 %v2433_v55 }
  0xc9   :  { %v97_v56 = vpop.f32.mrf.mxu0 }
  0xcb   :  { %v99_v57 = vpop.f32.mrf.mxu0 }
  0xcc   :  { %v2680_v13 = vpop.f32.mrf.mxu1 }
  0xcd   :  { %v2663_v58 = vpop.f32.mrf.mxu0 }
  0xce   :  { %v2708_v29 = vpop.f32.mrf.mxu1 }
  0xcf   :  { %v2665_v59 = vpop.f32.mrf.mxu0 }
  0xd0   :  { %v2722_v37 = vpop.f32.mrf.mxu1 }
  0xd1   :  { %v215_v60 = vpop.f32.mrf.mxu0 }
  0xd2   :  { %v267_v3 = vmax.f32 %v97_v56, %v215_v60  ;;  %v2736_v49 = vpop.f32.mrf.mxu1  ;;  %v644_v60 = vld [vmem:[%s3018_s2 + $0xc0] sm:$0x11] }
  0xd3   :  { %v217_v61 = vpop.f32.mrf.mxu0 }
  0xd4   :  { %v268_v5 = vmax.f32 %v99_v57, %v217_v61  ;;  %v2744_v57 = vld [vmem:[%s3018_s2 + $0x40] sm:$0xff]  ;;  %v2749_v61 = vpop.f32.mrf.mxu1 }
  0xd5   :  { %v2667_v62 = vpop.f32.mrf.mxu0 }
  0xd7   :  { %v2669_v63 = vpop.f32.mrf.mxu0 }
  0xd9   :  { %v341_v0 = vpop.f32.mrf.mxu0 }
  0xda   :  { %v393_v6 = vmax.f32 %v267_v3, %v341_v0  ;;  %v2438_v3 = vcombine.low %v2716_v34, %v642_v35 }
  0xdb   :  { %v343_v1 = vpop.f32.mrf.mxu0 }
  0xdc   :  { %v394_v8 = vmax.f32 %v268_v5, %v343_v1  ;;  %v272_v1 = vmax.f32 %v2665_v59, %v2669_v63  ;;  %v2440_v63 = vcombine.low %v2729_v40, %v643_v41  ;;  %v2810_v41 = vld [vmem:[%s3018_s2 + $0x60] sm:$0xff] }
  0xdd   :  { %v2671_v2 = vpop.f32.mrf.mxu0 }
  0xdf   :  { %v2673_v4 = vpop.f32.mrf.mxu0 }
  0xe0   :  { %v398_v14 = vmax.f32 %v272_v1, %v2673_v4  ;;  %v2776_v4 = vld [vmem:[%s3018_s2 + $0x50] sm:$0xff] }
  0xe1   :  { %v467_v7 = vpop.f32.mrf.mxu0 }
  0xe2   :  { %v2675_v9 = vmax.f32 %v393_v6, %v467_v7  ;;  %v2759_v6 = vld [vmem:[%s3018_s2 + $0x48] sm:$0xff] }
  0xe3   :  { %v469_v10 = vpop.f32.mrf.mxu0  ;;  %v645_v7 = vld [vmem:[%s3018_s2 + $0xc8] sm:$0x11] }
  0xe4   :  { %v2677_v11 = vmax.f32 %v394_v8, %v469_v10  ;;  %v530_v12 = vrot.slane %v2675_v9, 1  ;;  %v588_v22 = vpack.c.bf16 %v2675_v9, %v2675_v9  ;;  %v534_v32 = vrot.slane %v2675_v9, 2 }
  0xe5   :  { %v538_v36 = vrot.slane %v2675_v9, 3  ;;  %v471_v54 = vpop.f32.mrf.mxu0  ;;  %v542_v55 = vrot.slane %v2675_v9, 4  ;;  %v546_v0 = vrot.slane %v2675_v9, 5  ;;  %v550_v21 = vrot.slane %v2675_v9, 6 }
  0xe6   :  { %v589_v15 = vpack.c.bf16 %v2677_v11, %v2677_v11  ;;  %v531_v17 = vrot.slane %v2677_v11, 1  ;;  %v535_v18 = vrot.slane %v2677_v11, 2  ;;  %v539_v23 = vrot.slane %v2677_v11, 3 }
  0xe7   :  { %v590_v27 = vpack.c.bf16 %v530_v12, %v530_v12  ;;  %v543_v33 = vrot.slane %v2677_v11, 4  ;;  %v547_v39 = vrot.slane %v2677_v11, 5  ;;  %v592_v43 = vpack.c.bf16 %v534_v32, %v534_v32  ;;  %v473_v8 = vpop.f32.mrf.mxu0 }
  0xe8   :  { %844 = vmatprep.mubr.bf16.mxu0 %v589_v15  ;;  %v591_v24 = vpack.c.bf16 %v531_v17, %v531_v17  ;;  %v593_v25 = vpack.c.bf16 %v535_v18, %v535_v18  ;;  %v595_v31 = vpack.c.bf16 %v539_v23, %v539_v23  ;;  %v594_v48 = vpack.c.bf16 %v538_v36, %v538_v36 }
  0xe9   :  { %845 = vmatmul.mubr.bf16.vlgmr.msra.gmra.mxu0 %v588_v22  ;;  %v597_v45 = vpack.c.bf16 %v543_v33, %v543_v33  ;;  %v599_v52 = vpack.c.bf16 %v547_v39, %v547_v39  ;;  %v551_v56 = vrot.slane %v2677_v11, 6  ;;  %v555_v5 = vrot.slane %v2677_v11, 7  ;;  %v2767_v11 = vpop.f32.mrf.mxu1  ;;  %v646_v22 = vld [vmem:[%s3018_s2 + $0xd0] sm:$0x11] }
  0xea   :  { %884 = vmatprep.mubr.bf16.mxu1 %v591_v24  ;;  %907 = vmatpush1.bf16.xpose.msra.mxu0 %v2430_v16  ;;  %v596_v10 = vpack.c.bf16 %v542_v55, %v542_v55  ;;  %v2443_v12 = vcombine.high %v2744_v57, %v644_v60  ;;  %v598_v15 = vpack.c.bf16 %v546_v0, %v546_v0 }
  0xeb   :  { %924 = vmatprep.mubr.bf16.mxu0 %v593_v25  ;;  %885 = vmatmul.mubr.bf16.vlgmr.msra.gmra.mxu1 %v590_v27  ;;  %v601_v59 = vpack.c.bf16 %v551_v56, %v551_v56  ;;  %v2445_v16 = vcombine.high %v2759_v6, %v645_v7  ;;  %v2770_v17 = vmax.f32 %v398_v14, %v473_v8  ;;  %v2783_v24 = vpop.f32.mrf.mxu1  ;;  %v554_v25 = vrot.slane %v2675_v9, 7 }
  0xec   :  { %947 = vmatpush1.bf16.xpose.msra.mxu1 %v2432_v26  ;;  %964 = vmatprep.mubr.bf16.mxu1 %v595_v31  ;;  %v603_v18 = vpack.c.bf16 %v555_v5, %v555_v5  ;;  %v271_v23 = vmax.f32 %v2663_v58, %v2667_v62  ;;  %v2442_v26 = vcombine.low %v2744_v57, %v644_v60 }
  0xed   :  { %986 = vmatprep.subr.bf16.mxu0 %v2435_v28  ;;  %1026 = vmatprep.subr.bf16.mxu1 %v2437_v30  ;;  %v561_v27 = vrot.slane %v2770_v17, 1  ;;  %v2791_v28 = vld [vmem:[%s3018_s2 + $0x58] sm:$0xff]  ;;  %v600_v62 = vpack.c.bf16 %v550_v21, %v550_v21  ;;  %v2447_v31 = vcombine.high %v2776_v4, %v646_v22  ;;  %v605_v9 = vpack.c.bf16 %v2770_v17, %v2770_v17  ;;  %v2803_v35 = vpop.f32.mrf.mxu1 }
  0xee   :  { %v647_v30 = vld [vmem:[%s3018_s2 + $0xd8] sm:$0x11]  ;;  %v397_v58 = vmax.f32 %v271_v23, %v2671_v2  ;;  %v2444_v32 = vcombine.low %v2759_v6, %v645_v7  ;;  %v602_v36 = vpack.c.bf16 %v554_v25, %v554_v25  ;;  %v565_v2 = vrot.slane %v2770_v17, 2 }
  0xef   :  { %v607_v39 = vpack.c.bf16 %v561_v27, %v561_v27  ;;  %v2448_v60 = vcombine.low %v2791_v28, %v647_v30  ;;  %v573_v8 = vrot.slane %v2770_v17, 4 }
  0xf0   :  { %v2801_v33 = vmax.f32 %v397_v58, %v471_v54  ;;  %v609_v56 = vpack.c.bf16 %v565_v2, %v565_v2  ;;  %v270_v58 = vmax.f32 %v2708_v29, %v2767_v11  ;;  %v1563_v2 = vld [vmem:[%s3018_s2 + $0x88] sm:$0x11] }
  0xf1   :  { %925 = vmatmul.mubr.bf16.vlgmr.msra.gmra.mxu0 %v592_v43  ;;  %v648_v43 = vld [vmem:[%s3018_s2 + $0xe0] sm:$0x11]  ;;  %v613_v23 = vpack.c.bf16 %v573_v8, %v573_v8 }
  0xf2   :  { %987 = vmatpush1.bf16.xpose.msra.mxu0 %v2434_v38  ;;  %1004 = vmatprep.mubr.bf16.mxu0 %v597_v45  ;;  %v2449_v38 = vcombine.high %v2791_v28, %v647_v30  ;;  %v560_v45 = vrot.slane %v2801_v33, 1  ;;  %v604_v54 = vpack.c.bf16 %v2801_v33, %v2801_v33  ;;  %v2451_v55 = vcombine.high %v2810_v41, %v648_v43 }
  0xf3   :  { %965 = vmatmul.mubr.bf16.vlgmr.msra.gmra.mxu1 %v594_v48  ;;  %1066 = vmatprep.subr.bf16.mxu0 %v2439_v44  ;;  %v2815_v44 = vpop.f32.mrf.mxu1  ;;  %v569_v48 = vrot.slane %v2770_v17, 3  ;;  %v564_v7 = vrot.slane %v2801_v33, 2 }
  0xf4   :  { %1027 = vmatpush1.bf16.xpose.msra.mxu1 %v2436_v47  ;;  %1044 = vmatprep.mubr.bf16.mxu1 %v599_v52  ;;  %v2446_v47 = vcombine.low %v2776_v4, %v646_v22  ;;  %v649_v52 = vld [vmem:[%s3018_s2 + $0xe8] sm:$0x11]  ;;  %v606_v1 = vpack.c.bf16 %v560_v45, %v560_v45 }
  0xf5   :  { %1106 = vmatprep.subr.bf16.mxu1 %v2441_v51  ;;  %v2823_v51 = vld [vmem:[%s3018_s2 + $0x68] sm:$0xff]  ;;  %v386_v0 = vpop.f32.mrf.mxu1  ;;  %v611_v5 = vpack.c.bf16 %v569_v48, %v569_v48  ;;  %v608_v21 = vpack.c.bf16 %v564_v7, %v564_v7  ;;  %v1565_v7 = vld [vmem:[%s3018_s2 + $0x98] sm:$0x11] }
  0xf6   :  { %v2452_v25 = vcombine.low %v2823_v51, %v649_v52  ;;  %v396_v29 = vmax.f32 %v270_v58, %v386_v0  ;;  %v580_v0 = vrot.slane %v2801_v33, 6 }
  0xf7   :  { %v2843_v14 = vpop.f32.mrf.mxu1 }
  0xf8   :  { %v616_v8 = vpack.c.bf16 %v580_v0, %v580_v0 }
  0xf9   :  { %1005 = vmatmul.mubr.bf16.vlgmr.msra.gmra.mxu0 %v596_v10  ;;  %v2838_v10 = vld [vmem:[%s3018_s2 + $0x70] sm:$0xff] }
  0xfa   :  { %1067 = vmatpush1.bf16.xpose.msra.mxu0 %v2438_v3  ;;  %1084 = vmatprep.mubr.bf16.mxu0 %v601_v59  ;;  %v2453_v3 = vcombine.high %v2823_v51, %v649_v52  ;;  %v568_v59 = vrot.slane %v2801_v33, 3  ;;  %v269_v52 = vmax.f32 %v2680_v13, %v2749_v61  ;;  %v1564_v13 = vld [vmem:[%s3018_s2 + $0x90] sm:$0x11] }
  0xfb   :  { %1045 = vmatmul.mubr.bf16.vlgmr.msra.gmra.mxu1 %v598_v15  ;;  %1146 = vmatprep.subr.bf16.mxu0 %v2443_v12  ;;  %v650_v12 = vld [vmem:[%s3018_s2 + $0xf0] sm:$0x11]  ;;  %v577_v15 = vrot.slane %v2770_v17, 5 }
  0xfc   :  { %1107 = vmatpush1.bf16.xpose.msra.mxu1 %v2440_v63  ;;  %1124 = vmatprep.mubr.bf16.mxu1 %v603_v18  ;;  %v2450_v63 = vcombine.low %v2810_v41, %v648_v43  ;;  %v651_v18 = vld [vmem:[%s3018_s2 + $0xf8] sm:$0x11]  ;;  %v2455_v22 = vcombine.high %v2838_v10, %v650_v12  ;;  %v610_v27 = vpack.c.bf16 %v568_v59, %v568_v59 }
  0xfd   :  { %1186 = vmatprep.subr.bf16.mxu1 %v2445_v16  ;;  %v2851_v16 = vld [vmem:[%s3018_s2 + $0x78] sm:$0xff]  ;;  %v2454_v11 = vcombine.low %v2838_v10, %v650_v12  ;;  %v395_v61 = vmax.f32 %v269_v52, %v2815_v44  ;;  %v2463_v12 = vcombine.high %v2648_v50, %v1564_v13 }
  0xfe   :  { %v2457_v30 = vcombine.high %v2851_v16, %v651_v18  ;;  %v2456_v48 = vcombine.low %v2851_v16, %v651_v18 }
 0x101   :  { %1085 = vmatmul.mubr.bf16.vlgmr.msra.gmra.mxu0 %v600_v62  ;;  %v615_v62 = vpack.c.bf16 %v577_v15, %v577_v15 }
 0x102   :  { %1147 = vmatpush1.bf16.xpose.msra.mxu0 %v2442_v26  ;;  %1164 = vmatprep.mubr.bf16.mxu0 %v605_v9  ;;  %v2858_v26 = vpop.f32.mrf.mxu1  ;;  %v581_v9 = vrot.slane %v2770_v17, 6 }
 0x103   :  { %1125 = vmatmul.mubr.bf16.vlgmr.msra.gmra.mxu1 %v602_v36  ;;  %1226 = vmatprep.subr.bf16.mxu0 %v2447_v31  ;;  %v572_v31 = vrot.slane %v2801_v33, 4 }
 0x104   :  { %1187 = vmatpush1.bf16.xpose.msra.mxu1 %v2444_v32  ;;  %1204 = vmatprep.mubr.bf16.mxu1 %v607_v39  ;;  %v1562_v32 = vld [vmem:[%s3018_s2 + $0x80] sm:$0x11]  ;;  %v510_v36 = vpop.f32.mrf.mxu1  ;;  %v585_v39 = vrot.slane %v2770_v17, 7 }
 0x105   :  { %1266 = vmatprep.subr.bf16.mxu1 %v2449_v38  ;;  %v576_v38 = vrot.slane %v2801_v33, 5  ;;  %v612_v43 = vpack.c.bf16 %v572_v31, %v572_v31  ;;  %v2459_v45 = vcombine.high %v2628_v42, %v1562_v32  ;;  %v2896_v44 = vmax.f32 %v395_v61, %v510_v36  ;;  %v1571_v61 = vld [vmem:[%s3018_s2 + $0xc8] sm:$0x11] }
 0x106   :  { %v619_v17 = vpack.c.bf16 %v585_v39, %v585_v39  ;;  %v1569_v39 = vld [vmem:[%s3018_s2 + $0xb8] sm:$0x11] }
 0x107   :  { %v2473_v52 = vcombine.high %v2729_v40, %v1569_v39  ;;  %v1472_v0 = vrot.slane %v2896_v44, 5 }
 0x109   :  { %1165 = vmatmul.mubr.bf16.vlgmr.msra.gmra.mxu0 %v604_v54  ;;  %v512_v54 = vpop.f32.mrf.mxu1 }
 0x10a   :  { %1227 = vmatpush1.bf16.xpose.msra.mxu0 %v2446_v47  ;;  %1244 = vmatprep.mubr.bf16.mxu0 %v609_v56  ;;  %v617_v47 = vpack.c.bf16 %v581_v9, %v581_v9  ;;  %v2461_v56 = vcombine.high %v2638_v46, %v1563_v2 }
 0x10b   :  { %1205 = vmatmul.mubr.bf16.vlgmr.msra.gmra.mxu1 %v606_v1  ;;  %1306 = vmatprep.subr.bf16.mxu0 %v2451_v55  ;;  %v614_v55 = vpack.c.bf16 %v576_v38, %v576_v38  ;;  %v584_v1 = vrot.slane %v2801_v33, 7  ;;  %v1568_v38 = vld [vmem:[%s3018_s2 + $0xb0] sm:$0x11] }
 0x10c   :  { %1267 = vmatpush1.bf16.xpose.msra.mxu1 %v2448_v60  ;;  %1284 = vmatprep.mubr.bf16.mxu1 %v611_v5  ;;  %v2879_v60 = vmax.f32 %v396_v29, %v512_v54  ;;  %v274_v54 = vmax.f32 %v2736_v49, %v2803_v35  ;;  %v2470_v35 = vcombine.low %v2716_v34, %v1568_v38 }
 0x10d   :  { %1346 = vmatprep.subr.bf16.mxu1 %v2453_v3  ;;  %v2458_v3 = vcombine.low %v2628_v42, %v1562_v32  ;;  %v618_v33 = vpack.c.bf16 %v584_v1, %v584_v1  ;;  %v2465_v42 = vcombine.high %v2657_v53, %v1565_v7  ;;  %v1460_v32 = vrot.slane %v2896_v44, 2 }
 0x10e   :  { %v1457_v5 = vrot.slane %v2879_v60, 1  ;;  %v1515_v59 = vpack.c.bf16 %v2879_v60, %v2879_v60  ;;  %v1461_v18 = vrot.slane %v2879_v60, 2  ;;  %v1469_v36 = vrot.slane %v2879_v60, 4 }
 0x10f   :  { %v400_v49 = vmax.f32 %v274_v54, %v2858_v26  ;;  %v1524_v26 = vpack.c.bf16 %v1472_v0, %v1472_v0 }
 0x110   :  { %v1517_v15 = vpack.c.bf16 %v1457_v5, %v1457_v5  ;;  %v1519_v58 = vpack.c.bf16 %v1461_v18, %v1461_v18 }
 0x111   :  { %1245 = vmatmul.mubr.bf16.vlgmr.msra.gmra.mxu0 %v608_v21  ;;  %v1566_v21 = vld [vmem:[%s3018_s2 + $0xa0] sm:$0x11] }
 0x112   :  { %1307 = vmatpush1.bf16.xpose.msra.mxu0 %v2450_v63  ;;  %1324 = vmatprep.mubr.bf16.mxu0 %v613_v23  ;;  %v2460_v63 = vcombine.low %v2638_v46, %v1563_v2  ;;  %v1456_v46 = vrot.slane %v2896_v44, 1  ;;  %v1465_v23 = vrot.slane %v2879_v60, 3  ;;  %v2466_v29 = vcombine.low %v2693_v19, %v1566_v21 }
 0x113   :  { %1285 = vmatmul.mubr.bf16.vlgmr.msra.gmra.mxu1 %v610_v27  ;;  %1386 = vmatprep.subr.bf16.mxu0 %v2455_v22  ;;  %v2462_v22 = vcombine.low %v2648_v50, %v1564_v13  ;;  %v1514_v27 = vpack.c.bf16 %v2896_v44, %v2896_v44  ;;  %v1518_v2 = vpack.c.bf16 %v1460_v32, %v1460_v32  ;;  %v1481_v13 = vrot.slane %v2879_v60, 7 }
 0x114   :  { %1347 = vmatpush1.bf16.xpose.msra.mxu1 %v2452_v25  ;;  %1364 = vmatprep.mubr.bf16.mxu1 %v615_v62  ;;  %v1567_v25 = vld [vmem:[%s3018_s2 + $0xa8] sm:$0x11]  ;;  %v2464_v62 = vcombine.low %v2657_v53, %v1565_v7  ;;  %v1516_v31 = vpack.c.bf16 %v1456_v46, %v1456_v46  ;;  %v1521_v50 = vpack.c.bf16 %v1465_v23, %v1465_v23  ;;  %v1464_v53 = vrot.slane %v2896_v44, 3 }
 0x115   :  { %1426 = vmatprep.subr.bf16.mxu1 %v2457_v30  ;;  %v2467_v30 = vcombine.high %v2693_v19, %v1566_v21  ;;  %v2469_v9 = vcombine.high %v2698_v20, %v1567_v25 }
 0x119   :  { %1325 = vmatmul.mubr.bf16.vlgmr.msra.gmra.mxu0 %v612_v43  ;;  %v2471_v43 = vcombine.high %v2716_v34, %v1568_v38  ;;  %v2477_v34 = vcombine.high %v2759_v6, %v1571_v61 }
 0x11a   :  { %1387 = vmatpush1.bf16.xpose.msra.mxu0 %v2454_v11  ;;  %1404 = vmatprep.mubr.bf16.mxu0 %v617_v47  ;;  %v1473_v11 = vrot.slane %v2879_v60, 5  ;;  %v2468_v47 = vcombine.low %v2698_v20, %v1567_v25  ;;  %v1570_v20 = vld [vmem:[%s3018_s2 + $0xc0] sm:$0x11] }
 0x11b   :  { %1365 = vmatmul.mubr.bf16.vlgmr.msra.gmra.mxu1 %v614_v55  ;;  %1752 = vmatprep.subr.bf16.mxu0 %v2459_v45  ;;  %v1523_v45 = vpack.c.bf16 %v1469_v36, %v1469_v36  ;;  %v514_v55 = vpop.f32.mrf.mxu1  ;;  %v2475_v5 = vcombine.high %v2744_v57, %v1570_v20 }
 0x11c   :  { %1427 = vmatpush1.bf16.xpose.msra.mxu1 %v2456_v48  ;;  %1444 = vmatprep.mubr.bf16.mxu1 %v619_v17  ;;  %v1520_v48 = vpack.c.bf16 %v1464_v53, %v1464_v53  ;;  %v1525_v19 = vpack.c.bf16 %v1473_v11, %v1473_v11  ;;  %v1477_v17 = vrot.slane %v2879_v60, 6  ;;  %v1529_v60 = vpack.c.bf16 %v1481_v13, %v1481_v13  ;;  %v1576_v11 = vld [vmem:[%s3018_s2 + $0xf0] sm:$0x11] }
 0x11d   :  { %1792 = vmatprep.subr.bf16.mxu1 %v2461_v56  ;;  %v1468_v56 = vrot.slane %v2896_v44, 4  ;;  %v516_v1 = vpop.f32.mrf.mxu1 }
 0x11e   :  { %v1527_v7 = vpack.c.bf16 %v1477_v17, %v1477_v17 }
 0x121   :  { %1405 = vmatmul.mubr.bf16.vlgmr.msra.gmra.mxu0 %v616_v8  ;;  %v2472_v8 = vcombine.low %v2729_v40, %v1569_v39  ;;  %v1572_v40 = vld [vmem:[%s3018_s2 + $0xd0] sm:$0x11] }
 0x122   :  { %1753 = vmatpush1.bf16.xpose.msra.mxu0 %v2458_v3  ;;  %1770 = vmatprep.mubr.bf16.mxu0 %v1515_v59  ;;  %v1522_v3 = vpack.c.bf16 %v1468_v56, %v1468_v56  ;;  %v2947_v59 = vmax.f32 %v400_v49, %v516_v1  ;;  %v2479_v21 = vcombine.high %v2776_v4, %v1572_v40 }
 0x123   :  { %1445 = vmatmul.mubr.bf16.vlgmr.msra.gmra.mxu1 %v618_v33  ;;  %1832 = vmatprep.subr.bf16.mxu0 %v2463_v12  ;;  %v273_v12 = vmax.f32 %v2722_v37, %v2783_v24  ;;  %v1480_v24 = vrot.slane %v2896_v44, 7  ;;  %v2474_v33 = vcombine.low %v2744_v57, %v1570_v20 }
 0x124   :  { %1793 = vmatpush1.bf16.xpose.msra.mxu1 %v2460_v63  ;;  %1810 = vmatprep.mubr.bf16.mxu1 %v1517_v15  ;;  %v1476_v63 = vrot.slane %v2896_v44, 6  ;;  %v1573_v15 = vld [vmem:[%s3018_s2 + $0xd8] sm:$0x11]  ;;  %v1531_v46 = vpack.c.bf16 %v2947_v59, %v2947_v59  ;;  %v1491_v25 = vrot.slane %v2947_v59, 2  ;;  %v1507_v56 = vrot.slane %v2947_v59, 6 }
 0x125   :  { %1872 = vmatprep.subr.bf16.mxu1 %v2465_v42  ;;  %v399_v37 = vmax.f32 %v273_v12, %v2843_v14  ;;  %v1487_v42 = vrot.slane %v2947_v59, 1  ;;  %v1528_v44 = vpack.c.bf16 %v1480_v24, %v1480_v24  ;;  %v2481_v57 = vcombine.high %v2791_v28, %v1573_v15  ;;  %v3007_v24 = vld [vmem:[%s3019_s3] sm:$0x1]  ;;  %s2516_s3 = smov [#allocation2]  }
 0x126   :  { %v1526_v18 = vpack.c.bf16 %v1476_v63, %v1476_v63  ;;  %v2480_v32 = vcombine.low %v2791_v28, %v1573_v15  ;;  %v1511_v20 = vrot.slane %v2947_v59, 7  ;;  %v1543_v49 = vpack.c.bf16 %v1507_v56, %v1507_v56  ;;  %s2385_s8 = sshll.u32 %s2516_s3, 4  ;;  %s2386_s8 = int_to_ptr.vmem [resolvable:$true] %s2385_s8 }
 0x127   :  { %v2964_v14 = vmax.f32 %v399_v37, %v514_v55  ;;  %v1533_v23 = vpack.c.bf16 %v1487_v42, %v1487_v42  ;;  %s2493_s9 = scalar_lea.vmem %s2386_s8, 32  ;;  %p2498_p1 = scmp.lt.s32.totalorder %s2386_s8, %s2386_s8 }
 0x128   :  { %p2494_p0 = scmp.ne.s32.totalorder %s2386_s8, %s2493_s9  ;;  %p2499_p2 = scmp.lt.s32.totalorder %s2493_s9, %s2493_s9 }
 0x129   :  { %1771 = vmatmul.mubr.bf16.vlgmr.msra.gmra.mxu0 %v1514_v27  ;;  %v1574_v27 = vld [vmem:[%s3018_s2 + $0xe0] sm:$0x11]  ;;  %v1490_v53 = vrot.slane %v2964_v14, 2  ;;  %v1494_v28 = vrot.slane %v2964_v14, 3  ;;  %v1502_v17 = vrot.slane %v2964_v14, 5  ;;  %v1506_v1 = vrot.slane %v2964_v14, 6 }
 0x12a   :  { %1833 = vmatpush1.bf16.xpose.msra.mxu0 %v2462_v22  ;;  %1850 = vmatprep.mubr.bf16.mxu0 %v1519_v58  ;;  %v2476_v22 = vcombine.low %v2759_v6, %v1571_v61  ;;  %v1486_v6 = vrot.slane %v2964_v14, 1  ;;  %v1495_v58 = vrot.slane %v2947_v59, 3  ;;  %v2482_v39 = vcombine.low %v2810_v41, %v1574_v27  ;;  %p2500_p3 = por %p2499_p2, %p2498_p1 }
 0x12b   :  { %1811 = vmatmul.mubr.bf16.vlgmr.msra.gmra.mxu1 %v1516_v31  ;;  %1912 = vmatprep.subr.bf16.mxu0 %v2467_v30  ;;  %v2478_v30 = vcombine.low %v2776_v4, %v1572_v40  ;;  %v1530_v31 = vpack.c.bf16 %v2964_v14, %v2964_v14  ;;  %v1536_v54 = vpack.c.bf16 %v1494_v28, %v1494_v28 }
 0x12c   :  { %1873 = vmatpush1.bf16.xpose.msra.mxu1 %v2464_v62  ;;  %1890 = vmatprep.mubr.bf16.mxu1 %v1521_v50  ;;  %v1575_v62 = vld [vmem:[%s3018_s2 + $0xe8] sm:$0x11]  ;;  %v1535_v50 = vpack.c.bf16 %v1491_v25, %v1491_v25  ;;  %v1532_v36 = vpack.c.bf16 %v1486_v6, %v1486_v6  ;;  %v1537_v4 = vpack.c.bf16 %v1495_v58, %v1495_v58  ;;  %p2501_p4 = pnand %p2500_p3, %p2494_p0 }
 0x12d   :  { %1952 = vmatprep.subr.bf16.mxu1 %v2469_v9  ;;  %v2483_v9 = vcombine.high %v2810_v41, %v1574_v27  ;;  %v2485_v38 = vcombine.high %v2823_v51, %v1575_v62  ;;  %v1498_v41 = vrot.slane %v2964_v14, 4  ;;  %v1540_v13 = vpack.c.bf16 %v1502_v17, %v1502_v17 }
 0x12e   :  { %v1545_v61 = vpack.c.bf16 %v1511_v20, %v1511_v20 }
 0x12f   :  { %v1538_v0 = vpack.c.bf16 %v1498_v41, %v1498_v41 }
 0x131   :  { %1851 = vmatmul.mubr.bf16.vlgmr.msra.gmra.mxu0 %v1518_v2  ;;  %v1503_v2 = vrot.slane %v2947_v59, 5 }
 0x132   :  { %1913 = vmatpush1.bf16.xpose.msra.mxu0 %v2466_v29  ;;  %1930 = vmatprep.mubr.bf16.mxu0 %v1523_v45  ;;  %v1499_v29 = vrot.slane %v2947_v59, 4  ;;  %v1534_v45 = vpack.c.bf16 %v1490_v53, %v1490_v53 }
 0x133   :  { %1891 = vmatmul.mubr.bf16.vlgmr.msra.gmra.mxu1 %v1520_v48  ;;  %1992 = vmatprep.subr.bf16.mxu0 %v2471_v43  ;;  %v1577_v43 = vld [vmem:[%s3018_s2 + $0xf8] sm:$0x11]  ;;  %v1541_v55 = vpack.c.bf16 %v1503_v2, %v1503_v2 }
 0x134   :  { %1953 = vmatpush1.bf16.xpose.msra.mxu1 %v2468_v47  ;;  %1970 = vmatprep.mubr.bf16.mxu1 %v1525_v19  ;;  %v2487_v47 = vcombine.high %v2838_v10, %v1576_v11  ;;  %v1539_v48 = vpack.c.bf16 %v1499_v29, %v1499_v29  ;;  %v2489_v19 = vcombine.high %v2851_v16, %v1577_v43 }
 0x135   :  { %2032 = vmatprep.subr.bf16.mxu1 %v2473_v52  ;;  %v2484_v52 = vcombine.low %v2823_v51, %v1575_v62  ;;  %v2486_v51 = vcombine.low %v2838_v10, %v1576_v11 }
 0x139   :  { %1931 = vmatmul.mubr.bf16.vlgmr.msra.gmra.mxu0 %v1522_v3  ;;  %v1510_v3 = vrot.slane %v2964_v14, 7 }
 0x13a   :  { %1993 = vmatpush1.bf16.xpose.msra.mxu0 %v2470_v35  ;;  %2010 = vmatprep.mubr.bf16.mxu0 %v1527_v7  ;;  %v2488_v35 = vcombine.low %v2851_v16, %v1577_v43 }
 0x13b   :  { %1971 = vmatmul.mubr.bf16.vlgmr.msra.gmra.mxu1 %v1524_v26  ;;  %2072 = vmatprep.subr.bf16.mxu0 %v2475_v5  ;;  %v1542_v5 = vpack.c.bf16 %v1506_v1, %v1506_v1  ;;  %v1544_v10 = vpack.c.bf16 %v1510_v3, %v1510_v3 }
 0x13c   :  { %2033 = vmatpush1.bf16.xpose.msra.mxu1 %v2472_v8  ;;  %2050 = vmatprep.mubr.bf16.mxu1 %v1529_v60 }
 0x13d   :  { %2112 = vmatprep.subr.bf16.mxu1 %v2477_v34 }
 0x141   :  { %2011 = vmatmul.mubr.bf16.vlgmr.msra.gmra.mxu0 %v1526_v18 }
 0x142   :  { %2073 = vmatpush1.bf16.xpose.msra.mxu0 %v2474_v33  ;;  %2090 = vmatprep.mubr.bf16.mxu0 %v1531_v46 }
 0x143   :  { %2051 = vmatmul.mubr.bf16.vlgmr.msra.gmra.mxu1 %v1528_v44  ;;  %2152 = vmatprep.subr.bf16.mxu0 %v2479_v21 }
 0x144   :  { %2113 = vmatpush1.bf16.xpose.msra.mxu1 %v2476_v22  ;;  %2130 = vmatprep.mubr.bf16.mxu1 %v1533_v23 }
 0x145   :  { %2192 = vmatprep.subr.bf16.mxu1 %v2481_v57 }
 0x149   :  { %2091 = vmatmul.mubr.bf16.vlgmr.msra.gmra.mxu0 %v1530_v31 }
 0x14a   :  { %2153 = vmatpush1.bf16.xpose.msra.mxu0 %v2478_v30  ;;  %2170 = vmatprep.mubr.bf16.mxu0 %v1535_v50 }
 0x14b   :  { %2131 = vmatmul.mubr.bf16.vlgmr.msra.gmra.mxu1 %v1532_v36  ;;  %2232 = vmatprep.subr.bf16.mxu0 %v2483_v9 }
 0x14c   :  { %2193 = vmatpush1.bf16.xpose.msra.mxu1 %v2480_v32  ;;  %2210 = vmatprep.mubr.bf16.mxu1 %v1537_v4 }
 0x14d   :  { %2272 = vmatprep.subr.bf16.mxu1 %v2485_v38 }
 0x151   :  { %2171 = vmatmul.mubr.bf16.vlgmr.msra.gmra.mxu0 %v1534_v45 }
 0x152   :  { %2233 = vmatpush1.bf16.xpose.msra.mxu0 %v2482_v39  ;;  %2250 = vmatprep.mubr.bf16.mxu0 %v1539_v48 }
 0x153   :  { %2211 = vmatmul.mubr.bf16.vlgmr.msra.gmra.mxu1 %v1536_v54  ;;  %2312 = vmatprep.subr.bf16.mxu0 %v2487_v47 }
 0x154   :  { %2273 = vmatpush1.bf16.xpose.msra.mxu1 %v2484_v52  ;;  %2290 = vmatprep.mubr.bf16.mxu1 %v1541_v55 }
 0x155   :  { %2352 = vmatprep.subr.bf16.mxu1 %v2489_v19 }
 0x159   :  { %2251 = vmatmul.mubr.bf16.vlgmr.msra.gmra.mxu0 %v1538_v0 }
 0x15a   :  { %2313 = vmatpush1.bf16.xpose.msra.mxu0 %v2486_v51  ;;  %2330 = vmatprep.mubr.bf16.mxu0 %v1543_v49 }
 0x15b   :  { %2291 = vmatmul.mubr.bf16.vlgmr.msra.gmra.mxu1 %v1540_v13 }
 0x15c   :  { %2353 = vmatpush1.bf16.xpose.msra.mxu1 %v2488_v35  ;;  %2370 = vmatprep.mubr.bf16.mxu1 %v1545_v61 }
 0x161   :  { %2331 = vmatmul.mubr.bf16.vlgmr.msra.gmra.mxu0 %v1542_v5 }
 0x163   :  { %2371 = vmatmul.mubr.bf16.vlgmr.msra.gmra.mxu1 %v1544_v10 }
 0x1a9   :  { %v846_v7 = vpop.f32.mrf.mxu0 }
 0x1aa   :  { %v847_v21 = vadd.f32 %v846_v7, %v3007_v24 }
 0x1ab   :  { %v848_v8 = vpop.f32.mrf.mxu0  ;;  %v886_v12 = vpop.f32.mrf.mxu1 }
 0x1ac   :  { %v887_v57 = vadd.f32 %v886_v12, %v847_v21 }
 0x1ad   :  { %v849_v16 = vpop.f32.mrf.mxu0  ;;  %v888_v26 = vpop.f32.mrf.mxu1 }
 0x1af   :  { %v850_v34 = vpop.f32.mrf.mxu0  ;;  %v889_v59 = vpop.f32.mrf.mxu1 }
 0x1b1   :  { %v890_v60 = vpop.f32.mrf.mxu1  ;;  %v926_v63 = vpop.f32.mrf.mxu0 }
 0x1b2   :  { %v927_v27 = vadd.f32 %v926_v63, %v887_v57 }
 0x1b3   :  { %v928_v40 = vpop.f32.mrf.mxu0  ;;  %v966_v37 = vpop.f32.mrf.mxu1 }
 0x1b4   :  { %v967_v31 = vadd.f32 %v966_v37, %v927_v27 }
 0x1b5   :  { %v929_v33 = vpop.f32.mrf.mxu0  ;;  %v968_v42 = vpop.f32.mrf.mxu1 }
 0x1b7   :  { %v930_v15 = vpop.f32.mrf.mxu0  ;;  %v969_v18 = vpop.f32.mrf.mxu1 }
 0x1b9   :  { %v970_v46 = vpop.f32.mrf.mxu1  ;;  %v1006_v22 = vpop.f32.mrf.mxu0 }
 0x1ba   :  { %v1007_v32 = vadd.f32 %v1006_v22, %v967_v31 }
 0x1bb   :  { %v1008_v14 = vpop.f32.mrf.mxu0  ;;  %v1046_v44 = vpop.f32.mrf.mxu1 }
 0x1bc   :  { %v1047_v29 = vadd.f32 %v1046_v44, %v1007_v32 }
 0x1bd   :  { %v1009_v23 = vpop.f32.mrf.mxu0  ;;  %v1048_v25 = vpop.f32.mrf.mxu1 }
 0x1bf   :  { %v1010_v6 = vpop.f32.mrf.mxu0  ;;  %v1049_v30 = vpop.f32.mrf.mxu1 }
 0x1c1   :  { %v1050_v58 = vpop.f32.mrf.mxu1  ;;  %v1086_v62 = vpop.f32.mrf.mxu0 }
 0x1c2   :  { %v1087_v39 = vadd.f32 %v1086_v62, %v1047_v29 }
 0x1c3   :  { %v1088_v9 = vpop.f32.mrf.mxu0  ;;  %v1126_v50 = vpop.f32.mrf.mxu1 }
 0x1c4   :  { %v1127_v48 = vadd.f32 %v1126_v50, %v1087_v39 }
 0x1c5   :  { %v1089_v36 = vpop.f32.mrf.mxu0  ;;  %v1128_v38 = vpop.f32.mrf.mxu1 }
 0x1c7   :  { %v1090_v4 = vpop.f32.mrf.mxu0  ;;  %v1129_v53 = vpop.f32.mrf.mxu1 }
 0x1c9   :  { %v1130_v11 = vpop.f32.mrf.mxu1  ;;  %v1166_v28 = vpop.f32.mrf.mxu0 }
 0x1ca   :  { %v1167_v19 = vadd.f32 %v1166_v28, %v1127_v48 }
 0x1cb   :  { %v1168_v2 = vpop.f32.mrf.mxu0  ;;  %v1206_v43 = vpop.f32.mrf.mxu1 }
 0x1cc   :  { %v1207_v51 = vadd.f32 %v1206_v43, %v1167_v19 }
 0x1cd   :  { %v1169_v45 = vpop.f32.mrf.mxu0  ;;  %v1208_v47 = vpop.f32.mrf.mxu1 }
 0x1cf   :  { %v1170_v52 = vpop.f32.mrf.mxu0  ;;  %v1209_v54 = vpop.f32.mrf.mxu1 }
 0x1d1   :  { %v1210_v55 = vpop.f32.mrf.mxu1  ;;  %v1246_v41 = vpop.f32.mrf.mxu0 }
 0x1d2   :  { %v1247_v49 = vadd.f32 %v1246_v41, %v1207_v51 }
 0x1d3   :  { %v1248_v56 = vpop.f32.mrf.mxu0  ;;  %v1286_v17 = vpop.f32.mrf.mxu1 }
 0x1d4   :  { %v1287_v3 = vadd.f32 %v1286_v17, %v1247_v49 }
 0x1d5   :  { %v1249_v20 = vpop.f32.mrf.mxu0  ;;  %v1288_v0 = vpop.f32.mrf.mxu1 }
 0x1d7   :  { %v1250_v35 = vpop.f32.mrf.mxu0  ;;  %v1289_v13 = vpop.f32.mrf.mxu1 }
 0x1d9   :  { %v1290_v61 = vpop.f32.mrf.mxu1  ;;  %v1326_v1 = vpop.f32.mrf.mxu0 }
 0x1da   :  { %v1327_v7 = vadd.f32 %v1326_v1, %v1287_v3 }
 0x1db   :  { %v1328_v5 = vpop.f32.mrf.mxu0  ;;  %v1366_v10 = vpop.f32.mrf.mxu1 }
 0x1dc   :  { %v1367_v34 = vadd.f32 %v1366_v10, %v1327_v7 }
 0x1dd   :  { %v1329_v8 = vpop.f32.mrf.mxu0  ;;  %v1368_v12 = vpop.f32.mrf.mxu1 }
 0x1df   :  { %v1330_v16 = vpop.f32.mrf.mxu0  ;;  %v1369_v26 = vpop.f32.mrf.mxu1 }
 0x1e1   :  { %v1370_v59 = vpop.f32.mrf.mxu1  ;;  %v1406_v60 = vpop.f32.mrf.mxu0 }
 0x1e2   :  { %v1407_v63 = vadd.f32 %v1406_v60, %v1367_v34 }
 0x1e3   :  { %v1408_v40 = vpop.f32.mrf.mxu0  ;;  %v1446_v37 = vpop.f32.mrf.mxu1 }
 0x1e4   :  { %v1447_v33 = vadd.f32 %v1446_v37, %v1407_v63 }
 0x1e5   :  { %v1409_v42 = vpop.f32.mrf.mxu0  ;;  %v1448_v15 = vpop.f32.mrf.mxu1 }
 0x1e6   :  { %1453 = vst.msk [vmem:[#allocation2] sm:$0x1] %vm1452_vm2, %v1447_v33 }
 0x1e7   :  { %v1410_v18 = vpop.f32.mrf.mxu0  ;;  %v1449_v21 = vpop.f32.mrf.mxu1 }
 0x1e9   :  { %v1450_v46 = vpop.f32.mrf.mxu1  ;;  %v1772_v22 = vpop.f32.mrf.mxu0 }
 0x1ea   :  { %v1773_v36 = vadd.f32 %v1772_v22, %v3007_v24 }
 0x1eb   :  { %v1774_v14 = vpop.f32.mrf.mxu0  ;;  %v1812_v44 = vpop.f32.mrf.mxu1 }
 0x1ec   :  { %v1813_v11 = vadd.f32 %v1812_v44, %v1773_v36 }
 0x1ed   :  { %v1775_v57 = vpop.f32.mrf.mxu0  ;;  %v1814_v23 = vpop.f32.mrf.mxu1 }
 0x1ef   :  { %v1776_v25 = vpop.f32.mrf.mxu0  ;;  %v1815_v27 = vpop.f32.mrf.mxu1 }
 0x1f1   :  { %v1816_v6 = vpop.f32.mrf.mxu1  ;;  %v1852_v30 = vpop.f32.mrf.mxu0 }
 0x1f2   :  { %v1853_v2 = vadd.f32 %v1852_v30, %v1813_v11 }
 0x1f3   :  { %v1854_v58 = vpop.f32.mrf.mxu0  ;;  %v1892_v62 = vpop.f32.mrf.mxu1 }
 0x1f4   :  { %v1893_v52 = vadd.f32 %v1892_v62, %v1853_v2 }
 0x1f5   :  { %v1855_v31 = vpop.f32.mrf.mxu0  ;;  %v1894_v9 = vpop.f32.mrf.mxu1 }
 0x1f7   :  { %v1856_v50 = vpop.f32.mrf.mxu0  ;;  %v1895_v32 = vpop.f32.mrf.mxu1 }
 0x1f9   :  { %v1896_v38 = vpop.f32.mrf.mxu1  ;;  %v1932_v4 = vpop.f32.mrf.mxu0 }
 0x1fa   :  { %v1933_v55 = vadd.f32 %v1932_v4, %v1893_v52 }
 0x1fb   :  { %v1934_v53 = vpop.f32.mrf.mxu0  ;;  %v1972_v29 = vpop.f32.mrf.mxu1 }
 0x1fc   :  { %v1973_v51 = vadd.f32 %v1972_v29, %v1933_v55 }
 0x1fd   :  { %v1935_v28 = vpop.f32.mrf.mxu0  ;;  %v1974_v39 = vpop.f32.mrf.mxu1 }
 0x1ff   :  { %v1936_v43 = vpop.f32.mrf.mxu0  ;;  %v1975_v45 = vpop.f32.mrf.mxu1 }
 0x201   :  { %v1976_v47 = vpop.f32.mrf.mxu1  ;;  %v2012_v48 = vpop.f32.mrf.mxu0 }
 0x202   :  { %v2013_v49 = vadd.f32 %v2012_v48, %v1973_v51 }
 0x203   :  { %v2014_v54 = vpop.f32.mrf.mxu0  ;;  %v2052_v19 = vpop.f32.mrf.mxu1 }
 0x204   :  { %v2053_v3 = vadd.f32 %v2052_v19, %v2013_v49 }
 0x205   :  { %v2015_v41 = vpop.f32.mrf.mxu0  ;;  %v2054_v56 = vpop.f32.mrf.mxu1 }
 0x207   :  { %v2016_v17 = vpop.f32.mrf.mxu0  ;;  %v2055_v24 = vpop.f32.mrf.mxu1 }
 0x209   :  { %v2056_v20 = vpop.f32.mrf.mxu1  ;;  %v2092_v0 = vpop.f32.mrf.mxu0 }
 0x20a   :  { %v2093_v7 = vadd.f32 %v2092_v0, %v2053_v3 }
 0x20b   :  { %v2094_v35 = vpop.f32.mrf.mxu0  ;;  %v2132_v13 = vpop.f32.mrf.mxu1 }
 0x20c   :  { %v2133_v34 = vadd.f32 %v2132_v13, %v2093_v7 }
 0x20d   :  { %v2095_v61 = vpop.f32.mrf.mxu0  ;;  %v2134_v1 = vpop.f32.mrf.mxu1 }
 0x20f   :  { %v2096_v5 = vpop.f32.mrf.mxu0  ;;  %v2135_v10 = vpop.f32.mrf.mxu1 }
 0x211   :  { %v2136_v8 = vpop.f32.mrf.mxu1  ;;  %v2172_v12 = vpop.f32.mrf.mxu0 }
 0x212   :  { %v2173_v63 = vadd.f32 %v2172_v12, %v2133_v34 }
 0x213   :  { %v2174_v16 = vpop.f32.mrf.mxu0  ;;  %v2212_v26 = vpop.f32.mrf.mxu1 }
 0x214   :  { %v2213_v15 = vadd.f32 %v2212_v26, %v2173_v63 }
 0x215   :  { %v2175_v59 = vpop.f32.mrf.mxu0  ;;  %v2214_v60 = vpop.f32.mrf.mxu1 }
 0x217   :  { %v2176_v40 = vpop.f32.mrf.mxu0  ;;  %v2215_v37 = vpop.f32.mrf.mxu1 }
 0x219   :  { %v2216_v33 = vpop.f32.mrf.mxu1  ;;  %v2252_v42 = vpop.f32.mrf.mxu0 }
 0x21a   :  { %v2253_v46 = vadd.f32 %v2252_v42, %v2213_v15 }
 0x21b   :  { %v2254_v18 = vpop.f32.mrf.mxu0  ;;  %v2292_v21 = vpop.f32.mrf.mxu1 }
 0x21c   :  { %v2293_v23 = vadd.f32 %v2292_v21, %v2253_v46 }
 0x21d   :  { %v2255_v22 = vpop.f32.mrf.mxu0  ;;  %v2294_v14 = vpop.f32.mrf.mxu1 }
 0x21f   :  { %v2256_v44 = vpop.f32.mrf.mxu0  ;;  %v2295_v57 = vpop.f32.mrf.mxu1 }
 0x221   :  { %v2296_v25 = vpop.f32.mrf.mxu1  ;;  %v2332_v27 = vpop.f32.mrf.mxu0 }
 0x222   :  { %v2333_v6 = vadd.f32 %v2332_v27, %v2293_v23 }
 0x223   :  { %v2334_v30 = vpop.f32.mrf.mxu0  ;;  %v2372_v58 = vpop.f32.mrf.mxu1 }
 0x224   :  { %v2373_v62 = vadd.f32 %v2372_v58, %v2333_v6 }
 0x225   :  { %v2335_v31 = vpop.f32.mrf.mxu0  ;;  %v2374_v9 = vpop.f32.mrf.mxu1 }
 0x226   :  { %2378 = vst.msk [vmem:[#allocation2 + $0x1] sm:$0x1] %vm1452_vm2, %v2373_v62 }
 0x227   :  { %v2336_v50 = vpop.f32.mrf.mxu0  ;;  %v2375_v32 = vpop.f32.mrf.mxu1 }
 0x228   :  { %2504 = shalt.err (!%p2501_p4)
}
 0x229   :  { %2388 = dma.vmem_to_hbm [thread:$0]  %s2386_s8, 32, %s3020_s4, [#allocation3]   ;;  %v2376_v36 = vpop.f32.mrf.mxu1 }
 0x22a   :  { %2513 = dma.done.wait [#allocation3], 32  }
 0x22b   :  { %2514 = vsyncadd [#allocation3], 4294967264 }
 0x22c   :  { %2392 = vsyncpa [#allocation3], 1 }

</bundles_post_ra>
